<compile_context>
chip_gen: v5e
topology: v5e:2x2
jax: 0.10.0
libtpu: 0.0.40
codegen_flags: <defaults>
</compile_context>

<pallas_src>
import jax
import jax.numpy as jnp
from jax.experimental import pallas as pl
from jax.experimental.pallas import tpu as pltpu

LN_EPS = 1e-5           # PyTorch nn.LayerNorm default
B_TILE_TARGET = 2048    # rows per grid step; sweep 2048-4096 on real workloads


def _round_up(x, m):
    return ((x + m - 1) // m) * m


def _pick_b_tile(b_pad):
    """b_pad is a multiple of 8. Returns a tile that is a multiple of 8 (16 when
    possible), <= b_pad, and keeps >= 2 grid steps when the batch is large
    enough so the 'parallel' batch axis can use both v7x TensorCores."""
    if b_pad < 32:
        return b_pad
    if b_pad <= 2 * B_TILE_TARGET:
        return _round_up(b_pad // 2, 16)
    return B_TILE_TARGET


def _layernorm(x, gamma, beta):
    mu = jnp.mean(x, axis=-1, keepdims=True)
    var = jnp.mean((x - mu) * (x - mu), axis=-1, keepdims=True)
    return (x - mu) * jax.lax.rsqrt(var + LN_EPS) * gamma + beta


def critic_kernel(x_ref, w1_ref, p1_ref, w2_ref, p2_ref, wv_ref, bv_ref,
                  out_ref):
    # ---- linear1 + ln1 + relu (f32 end to end) ----
    h = jnp.dot(x_ref[...], w1_ref[...], preferred_element_type=jnp.float32)
    h = h + p1_ref[0:1, :]                               # bias1
    h = _layernorm(h, p1_ref[1:2, :], p1_ref[2:3, :])    # ln1
    h = jnp.maximum(h, 0.0)                              # relu

    # ---- linear2 + ln2 + relu ----
    h = jnp.dot(h, w2_ref[...], preferred_element_type=jnp.float32)
    h = h + p2_ref[0:1, :]
    h = _layernorm(h, p2_ref[1:2, :], p2_ref[2:3, :])
    h = jnp.maximum(h, 0.0)

    # ---- V head (narrow, masked store) ----
    v = jnp.dot(h, wv_ref[...], preferred_element_type=jnp.float32)
    out_ref[...] = (v + bv_ref[...]).astype(out_ref.dtype)


def prepare_params(params):
    """One-time parameter preparation, hoisted out of the per-call forward path.
    Packs (bias, gamma, beta) into a single (3, feat) slab per layer and
    normalizes vector shapes to (1, feat)."""
    h2 = params["w2"].shape[0]
    hidden = params["w2"].shape[1]
    reward_size = params["wv"].shape[1]

    def _row(v, feat):
        v = jnp.asarray(v, jnp.float32)
        assert v.size == feat, f"expected {feat} elements, got shape {v.shape}"
        return v.reshape(1, feat)

    p1 = jnp.concatenate([_row(params["b1"], h2),
                          _row(params["g1"], h2),
                          _row(params["be1"], h2)], axis=0)
    p2 = jnp.concatenate([_row(params["b2"], hidden),
                          _row(params["g2"], hidden),
                          _row(params["be2"], hidden)], axis=0)
    return {
        "w1": jnp.asarray(params["w1"], jnp.float32),
        "p1": p1,
        "w2": jnp.asarray(params["w2"], jnp.float32),
        "p2": p2,
        "wv": jnp.asarray(params["wv"], jnp.float32),
        "bv": _row(params["bv"], reward_size),
    }


def critic_forward(inputs, actions, preference, prep):
    B = inputs.shape[0]
    in_dim = prep["w1"].shape[0]
    reward_size = prep["wv"].shape[1]

    # Single fused input stream (one DMA + one MXU push for layer 1).
    x = jnp.concatenate([inputs, actions, preference], axis=1).astype(jnp.float32)
    assert x.shape[1] == in_dim

    # Pad the batch only up to a sublane multiple of 8 (at most 7 rows); the
    # partial final grid block is boundary-handled by Pallas (masked writes).
    B_pad = _round_up(B, 8)
    if B_pad != B:
        x = jnp.pad(x, ((0, B_pad - B), (0, 0)))

    b_tile = _pick_b_tile(B_pad)
    grid = (pl.cdiv(B_pad, b_tile),)

    def batch_spec(feat):
        return pl.BlockSpec((b_tile, feat), lambda i: (i, 0))

    def resident(arr):
        # Constant index_map: DMA'd once, stays resident in VMEM across steps.
        return pl.BlockSpec(arr.shape, lambda i: (0, 0))

    out = pl.pallas_call(
        critic_kernel,
        out_shape=jax.ShapeDtypeStruct((B_pad, reward_size), jnp.float32),
        grid=grid,
        in_specs=[
            batch_spec(in_dim),                        # fused x
            resident(prep["w1"]), resident(prep["p1"]),
            resident(prep["w2"]), resident(prep["p2"]),
            resident(prep["wv"]), resident(prep["bv"]),
        ],
        out_specs=batch_spec(reward_size),
        compiler_params=pltpu.CompilerParams(
            dimension_semantics=("parallel",),
            vmem_limit_bytes=32 * 1024 * 1024,
        ),
    )(x, prep["w1"], prep["p1"], prep["w2"], prep["p2"], prep["wv"], prep["bv"])

    return out[:B] if B_pad != B else out


def init_params(key, hidden_size, num_inputs, num_outputs, reward_size):
    """Deterministic parameter init mirroring the PyTorch module's __init__."""
    in_dim = num_inputs + num_outputs + reward_size
    h2 = 2 * hidden_size
    keys = jax.random.split(key, 6)

    def lin_bias(k, fan_in, out_dim):
        bound = 1.0 / jnp.sqrt(fan_in)
        return jax.random.uniform(k, (1, out_dim), jnp.float32, -bound, bound)

    return {
        # linear1: weight ~ N(0, 0.02), stored as [in, out]
        "w1": 0.02 * jax.random.normal(keys[0], (in_dim, h2), jnp.float32),
        "b1": lin_bias(keys[1], in_dim, h2),
        "g1": jnp.ones((1, h2), jnp.float32),
        "be1": jnp.zeros((1, h2), jnp.float32),
        # linear2: weight ~ N(0, 0.02)
        "w2": 0.02 * jax.random.normal(keys[2], (h2, hidden_size), jnp.float32),
        "b2": lin_bias(keys[3], h2, hidden_size),
        "g2": jnp.ones((1, hidden_size), jnp.float32),
        "be2": jnp.zeros((1, hidden_size), jnp.float32),
        # V: weight ~ U(-0.003, 0.003)
        "wv": jax.random.uniform(keys[4], (hidden_size, reward_size),
                                 jnp.float32, -0.003, 0.003),
        "bv": lin_bias(keys[5], hidden_size, reward_size),
    }


def critic_reference(inputs, actions, preference, params):
    """Pure-JAX f32 reference (exact module semantics) for correctness check."""
    x = jnp.concatenate([inputs, actions, preference], axis=1)
    h = x @ params["w1"] + params["b1"]
    h = _layernorm(h, params["g1"], params["be1"])
    h = jnp.maximum(h, 0.0)
    h = h @ params["w2"] + params["b2"]
    h = _layernorm(h, params["g2"], params["be2"])
    h = jnp.maximum(h, 0.0)
    return h @ params["wv"] + params["bv"]


if __name__ == "__main__":
    hidden_size = 32
    num_inputs = 16
    num_outputs = 4      # action_space.shape[0]
    reward_size = 3
    batch = 2

    key = jax.random.PRNGKey(0)
    k_par, k_in, k_act, k_pref = jax.random.split(key, 4)

    params = init_params(k_par, hidden_size, num_inputs, num_outputs, reward_size)
    prep = prepare_params(params)   # one-time prep, hoisted out of the forward

    inputs = jax.random.normal(k_in, (batch, num_inputs), jnp.float32)
    actions = jax.random.normal(k_act, (batch, num_outputs), jnp.float32)
    preference = jax.random.normal(k_pref, (batch, reward_size), jnp.float32)

    v = critic_forward(inputs, actions, preference, prep)
    jax.block_until_ready(v)

    v_ref = critic_reference(inputs, actions, preference, params)
    assert v.shape == (batch, reward_size)
    # f32 matmuls end-to-end -> only matmul-rounding-order differences remain.
    assert jnp.allclose(v, v_ref, atol=1e-3, rtol=1e-2), "mismatch vs reference"
    print("KERNEL_OK")
</pallas_src>

<mosaic_0001>
module attributes {stable_mosaic.version = 11 : i64} {
  func.func @critic_kernel(%arg0: i32, %arg1: memref<8x23xf32, #tpu.memory_space<vmem>>, %arg2: memref<23x64xf32, #tpu.memory_space<vmem>>, %arg3: memref<3x64xf32, #tpu.memory_space<vmem>>, %arg4: memref<64x32xf32, #tpu.memory_space<vmem>>, %arg5: memref<3x32xf32, #tpu.memory_space<vmem>>, %arg6: memref<32x3xf32, #tpu.memory_space<vmem>>, %arg7: memref<1x3xf32, #tpu.memory_space<vmem>>, %arg8: memref<8x3xf32, #tpu.memory_space<vmem>>) attributes {dimension_semantics = [#tpu.dimension_semantics<parallel>], iteration_bounds = array<i64: 1>, scalar_prefetch = 0 : i64, scratch_operands = 0 : i64, tpu.core_type = #tpu.core_type<tc>, window_params = [{transform_indices = @transform_0, window_bounds = array<i64: 8, 23>}, {pipeline_mode = #tpu.pipeline_mode<synchronous>, transform_indices = @transform_1, window_bounds = array<i64: 23, 64>}, {pipeline_mode = #tpu.pipeline_mode<synchronous>, transform_indices = @transform_2, window_bounds = array<i64: 3, 64>}, {pipeline_mode = #tpu.pipeline_mode<synchronous>, transform_indices = @transform_3, window_bounds = array<i64: 64, 32>}, {pipeline_mode = #tpu.pipeline_mode<synchronous>, transform_indices = @transform_4, window_bounds = array<i64: 3, 32>}, {pipeline_mode = #tpu.pipeline_mode<synchronous>, transform_indices = @transform_5, window_bounds = array<i64: 32, 3>}, {pipeline_mode = #tpu.pipeline_mode<synchronous>, transform_indices = @transform_6, window_bounds = array<i64: 1, 3>}, {transform_indices = @transform_7, window_bounds = array<i64: 8, 3>}]} {
    %c0 = arith.constant 0 : index
    %c0_0 = arith.constant 0 : index
    %0 = vector.load %arg1[%c0, %c0_0] : memref<8x23xf32, #tpu.memory_space<vmem>>, vector<8x23xf32>
    %c0_1 = arith.constant 0 : index
    %c0_2 = arith.constant 0 : index
    %1 = vector.load %arg2[%c0_1, %c0_2] : memref<23x64xf32, #tpu.memory_space<vmem>>, vector<23x64xf32>
    %cst = arith.constant dense<0.000000e+00> : vector<8x64xf32>
    %2 = tpu.matmul %0, %1, %cst {dimension_numbers = #tpu.dot_dimension_numbers<[1], [0], [0], [1], [0, 0, 1, 1], [], []>} : vector<8x23xf32>, vector<23x64xf32>, vector<8x64xf32> -> vector<8x64xf32>
    %c0_3 = arith.constant 0 : index
    %c0_4 = arith.constant 0 : index
    %3 = vector.load %arg3[%c0_3, %c0_4] : memref<3x64xf32, #tpu.memory_space<vmem>>, vector<1x64xf32>
    %4 = vector.broadcast %3 : vector<1x64xf32> to vector<8x64xf32>
    %5 = arith.addf %2, %4 : vector<8x64xf32>
    %c1 = arith.constant 1 : index
    %c0_5 = arith.constant 0 : index
    %6 = vector.load %arg3[%c1, %c0_5] : memref<3x64xf32, #tpu.memory_space<vmem>>, vector<1x64xf32>
    %c2 = arith.constant 2 : index
    %c0_6 = arith.constant 0 : index
    %7 = vector.load %arg3[%c2, %c0_6] : memref<3x64xf32, #tpu.memory_space<vmem>>, vector<1x64xf32>
    %cst_7 = arith.constant dense<0.000000e+00> : vector<8xf32>
    %8 = vector.multi_reduction <add>, %5, %cst_7 [1] : vector<8x64xf32> to vector<8xf32>
    %9 = vector.shape_cast %8 : vector<8xf32> to vector<8x1xf32>
    %cst_8 = arith.constant 6.400000e+01 : f32
    %10 = vector.broadcast %cst_8 : f32 to vector<8x1xf32>
    %11 = arith.divf %9, %10 : vector<8x1xf32>
    %12 = vector.broadcast %11 : vector<8x1xf32> to vector<8x64xf32>
    %13 = arith.subf %5, %12 : vector<8x64xf32>
    %14 = vector.broadcast %11 : vector<8x1xf32> to vector<8x64xf32>
    %15 = arith.subf %5, %14 : vector<8x64xf32>
    %16 = arith.mulf %13, %15 : vector<8x64xf32>
    %cst_9 = arith.constant dense<0.000000e+00> : vector<8xf32>
    %17 = vector.multi_reduction <add>, %16, %cst_9 [1] : vector<8x64xf32> to vector<8xf32>
    %18 = vector.shape_cast %17 : vector<8xf32> to vector<8x1xf32>
    %cst_10 = arith.constant 6.400000e+01 : f32
    %19 = vector.broadcast %cst_10 : f32 to vector<8x1xf32>
    %20 = arith.divf %18, %19 : vector<8x1xf32>
    %21 = vector.broadcast %11 : vector<8x1xf32> to vector<8x64xf32>
    %22 = arith.subf %5, %21 : vector<8x64xf32>
    %cst_11 = arith.constant 9.99999974E-6 : f32
    %23 = vector.broadcast %cst_11 : f32 to vector<8x1xf32>
    %24 = arith.addf %20, %23 : vector<8x1xf32>
    %25 = math.rsqrt %24 : vector<8x1xf32>
    %26 = vector.broadcast %25 : vector<8x1xf32> to vector<8x64xf32>
    %27 = arith.mulf %22, %26 : vector<8x64xf32>
    %28 = vector.broadcast %6 : vector<1x64xf32> to vector<8x64xf32>
    %29 = arith.mulf %27, %28 : vector<8x64xf32>
    %30 = vector.broadcast %7 : vector<1x64xf32> to vector<8x64xf32>
    %31 = arith.addf %29, %30 : vector<8x64xf32>
    %cst_12 = arith.constant 0.000000e+00 : f32
    %32 = vector.broadcast %cst_12 : f32 to vector<8x64xf32>
    %33 = arith.maximumf %31, %32 : vector<8x64xf32>
    %c0_13 = arith.constant 0 : index
    %c0_14 = arith.constant 0 : index
    %34 = vector.load %arg4[%c0_13, %c0_14] : memref<64x32xf32, #tpu.memory_space<vmem>>, vector<64x32xf32>
    %cst_15 = arith.constant dense<0.000000e+00> : vector<8x32xf32>
    %35 = tpu.matmul %33, %34, %cst_15 {dimension_numbers = #tpu.dot_dimension_numbers<[1], [0], [0], [1], [0, 0, 1, 1], [], []>} : vector<8x64xf32>, vector<64x32xf32>, vector<8x32xf32> -> vector<8x32xf32>
    %c0_16 = arith.constant 0 : index
    %c0_17 = arith.constant 0 : index
    %36 = vector.load %arg5[%c0_16, %c0_17] : memref<3x32xf32, #tpu.memory_space<vmem>>, vector<1x32xf32>
    %37 = vector.broadcast %36 : vector<1x32xf32> to vector<8x32xf32>
    %38 = arith.addf %35, %37 : vector<8x32xf32>
    %c1_18 = arith.constant 1 : index
    %c0_19 = arith.constant 0 : index
    %39 = vector.load %arg5[%c1_18, %c0_19] : memref<3x32xf32, #tpu.memory_space<vmem>>, vector<1x32xf32>
    %c2_20 = arith.constant 2 : index
    %c0_21 = arith.constant 0 : index
    %40 = vector.load %arg5[%c2_20, %c0_21] : memref<3x32xf32, #tpu.memory_space<vmem>>, vector<1x32xf32>
    %cst_22 = arith.constant dense<0.000000e+00> : vector<8xf32>
    %41 = vector.multi_reduction <add>, %38, %cst_22 [1] : vector<8x32xf32> to vector<8xf32>
    %42 = vector.shape_cast %41 : vector<8xf32> to vector<8x1xf32>
    %cst_23 = arith.constant 3.200000e+01 : f32
    %43 = vector.broadcast %cst_23 : f32 to vector<8x1xf32>
    %44 = arith.divf %42, %43 : vector<8x1xf32>
    %45 = vector.broadcast %44 : vector<8x1xf32> to vector<8x32xf32>
    %46 = arith.subf %38, %45 : vector<8x32xf32>
    %47 = vector.broadcast %44 : vector<8x1xf32> to vector<8x32xf32>
    %48 = arith.subf %38, %47 : vector<8x32xf32>
    %49 = arith.mulf %46, %48 : vector<8x32xf32>
    %cst_24 = arith.constant dense<0.000000e+00> : vector<8xf32>
    %50 = vector.multi_reduction <add>, %49, %cst_24 [1] : vector<8x32xf32> to vector<8xf32>
    %51 = vector.shape_cast %50 : vector<8xf32> to vector<8x1xf32>
    %cst_25 = arith.constant 3.200000e+01 : f32
    %52 = vector.broadcast %cst_25 : f32 to vector<8x1xf32>
    %53 = arith.divf %51, %52 : vector<8x1xf32>
    %54 = vector.broadcast %44 : vector<8x1xf32> to vector<8x32xf32>
    %55 = arith.subf %38, %54 : vector<8x32xf32>
    %cst_26 = arith.constant 9.99999974E-6 : f32
    %56 = vector.broadcast %cst_26 : f32 to vector<8x1xf32>
    %57 = arith.addf %53, %56 : vector<8x1xf32>
    %58 = math.rsqrt %57 : vector<8x1xf32>
    %59 = vector.broadcast %58 : vector<8x1xf32> to vector<8x32xf32>
    %60 = arith.mulf %55, %59 : vector<8x32xf32>
    %61 = vector.broadcast %39 : vector<1x32xf32> to vector<8x32xf32>
    %62 = arith.mulf %60, %61 : vector<8x32xf32>
    %63 = vector.broadcast %40 : vector<1x32xf32> to vector<8x32xf32>
    %64 = arith.addf %62, %63 : vector<8x32xf32>
    %cst_27 = arith.constant 0.000000e+00 : f32
    %65 = vector.broadcast %cst_27 : f32 to vector<8x32xf32>
    %66 = arith.maximumf %64, %65 : vector<8x32xf32>
    %c0_28 = arith.constant 0 : index
    %c0_29 = arith.constant 0 : index
    %67 = vector.load %arg6[%c0_28, %c0_29] : memref<32x3xf32, #tpu.memory_space<vmem>>, vector<32x3xf32>
    %cst_30 = arith.constant dense<0.000000e+00> : vector<8x3xf32>
    %68 = tpu.matmul %66, %67, %cst_30 {dimension_numbers = #tpu.dot_dimension_numbers<[1], [0], [0], [1], [0, 0, 1, 1], [], []>} : vector<8x32xf32>, vector<32x3xf32>, vector<8x3xf32> -> vector<8x3xf32>
    %c0_31 = arith.constant 0 : index
    %c0_32 = arith.constant 0 : index
    %69 = vector.load %arg7[%c0_31, %c0_32] : memref<1x3xf32, #tpu.memory_space<vmem>>, vector<1x3xf32>
    %70 = vector.broadcast %69 : vector<1x3xf32> to vector<8x3xf32>
    %71 = arith.addf %68, %70 : vector<8x3xf32>
    %c0_33 = arith.constant 0 : index
    %c0_34 = arith.constant 0 : index
    %72 = vector.load %arg8[%c0_33, %c0_34] : memref<8x3xf32, #tpu.memory_space<vmem>>, vector<8x3xf32>
    tpu.vector_store %arg8[%c0_33, %c0_34], %71 {strides = array<i32>} : memref<8x3xf32, #tpu.memory_space<vmem>>, vector<8x3xf32>,
    return
  }
  func.func @transform_0(%arg0: i32) -> (i32, i32) {
    %c0_i32 = arith.constant 0 : i32
    %c0_i32_0 = arith.constant 0 : i32
    return %arg0, %c0_i32 : i32, i32
  }
  func.func @transform_1(%arg0: i32) -> (i32, i32) {
    %c0_i32 = arith.constant 0 : i32
    %c0_i32_0 = arith.constant 0 : i32
    %c0_i32_1 = arith.constant 0 : i32
    return %c0_i32, %c0_i32_0 : i32, i32
  }
  func.func @transform_2(%arg0: i32) -> (i32, i32) {
    %c0_i32 = arith.constant 0 : i32
    %c0_i32_0 = arith.constant 0 : i32
    %c0_i32_1 = arith.constant 0 : i32
    return %c0_i32, %c0_i32_0 : i32, i32
  }
  func.func @transform_3(%arg0: i32) -> (i32, i32) {
    %c0_i32 = arith.constant 0 : i32
    %c0_i32_0 = arith.constant 0 : i32
    %c0_i32_1 = arith.constant 0 : i32
    return %c0_i32, %c0_i32_0 : i32, i32
  }
  func.func @transform_4(%arg0: i32) -> (i32, i32) {
    %c0_i32 = arith.constant 0 : i32
    %c0_i32_0 = arith.constant 0 : i32
    %c0_i32_1 = arith.constant 0 : i32
    return %c0_i32, %c0_i32_0 : i32, i32
  }
  func.func @transform_5(%arg0: i32) -> (i32, i32) {
    %c0_i32 = arith.constant 0 : i32
    %c0_i32_0 = arith.constant 0 : i32
    %c0_i32_1 = arith.constant 0 : i32
    return %c0_i32, %c0_i32_0 : i32, i32
  }
  func.func @transform_6(%arg0: i32) -> (i32, i32) {
    %c0_i32 = arith.constant 0 : i32
    %c0_i32_0 = arith.constant 0 : i32
    %c0_i32_1 = arith.constant 0 : i32
    return %c0_i32, %c0_i32_0 : i32, i32
  }
  func.func @transform_7(%arg0: i32) -> (i32, i32) {
    %c0_i32 = arith.constant 0 : i32
    %c0_i32_0 = arith.constant 0 : i32
    return %arg0, %c0_i32 : i32, i32
  }
}

</mosaic_0001>

<bundles_post_ra>
// kernel: tpu_custom_call.1
= control target key start
LH: loop header
LB: loop body
LE: loop exit
PB: predicated region body
PF: predicated region fallthrough
CT: control target
= control target key end

     0   :  { %vm36_vm0 = vcmask 1046528   ;;  %vm32_vm1 = vcmask 187392   ;;  %vm62_vm2 = vcmask 523264   ;;  %v225_v8 = vmov 64.0   ;;  %s345_s1 = inlined_call_operand.vmem [shape: f32[23,64], index: 1, kind: input, shape index: {}]   ;;  %s346_s0 = inlined_call_operand.vmem [shape: f32[8,23], index: 0, kind: input, shape index: {}]   ;;  %s347_s2 = inlined_call_operand.vmem [shape: f32[3,64], index: 2, kind: input, shape index: {}]   ;;  %s348_s4 = inlined_call_operand.vmem [shape: f32[3,32], index: 4, kind: input, shape index: {}]   ;;  %s349_s3 = inlined_call_operand.vmem [shape: f32[64,32], index: 3, kind: input, shape index: {}]   ;;  %s350_s6 = inlined_call_operand.vmem [shape: f32[1,3], index: 6, kind: input, shape index: {}]   ;;  %s351_s5 = inlined_call_operand.vmem [shape: f32[32,3], index: 5, kind: input, shape index: {}]   ;;  %s352_s7 = inlined_call_operand.vmem [shape: f32[8,3], index: 7, kind: output, shape index: {}]  }
   0x1   :  { %v29_v0 = vld [vmem:[%s345_s1 + $0x10] sm:$0x7f]  ;;  %v28_v1 = vld [vmem:[%s345_s1 + $0x8] sm:$0xff]  ;;  %v27_v2 = vld [vmem:[%s345_s1] sm:$0xff]  ;;  %217 = vrcp.f32 %v225_v8  ;;  %vm132_vm7 = vcmask 261120   ;;  %v226_v48 = vmov 32.0  }
   0x2   :  { %204 = vmatpush.msk.msra.mxu0 %vm36_vm0, %v29_v0  ;;  %v26_v3 = vld [vmem:[%s346_s0] sm:$0xff]  ;;  %v104_v20 = vld [vmem:[%s349_s3 + $0x38] sm:$0xff]  ;;  %v103_v21 = vld [vmem:[%s349_s3 + $0x30] sm:$0xff]  ;;  %vm198_vm12 = vcmask 23552  }
   0x3   :  { %v210_v4 = vld [vmem:[%s347_s2] ss:$0 sm:$0xff]  ;;  %118 = vmatpush.msra.mxu1 %v104_v20  ;;  %v102_v22 = vld [vmem:[%s349_s3 + $0x28] sm:$0xff]  ;;  %v100_v24 = vld [vmem:[%s349_s3 + $0x18] sm:$0xff] }
   0x4   :  { %54 = vmatpush.msra.mxu0 %v28_v1  ;;  %v101_v23 = vld [vmem:[%s349_s3 + $0x20] sm:$0xff]  ;;  %v99_v25 = vld [vmem:[%s349_s3 + $0x10] sm:$0xff]  ;;  %v98_v26 = vld [vmem:[%s349_s3 + $0x8] sm:$0xff] }
   0x5   :  { %119 = vmatpush.msra.mxu1 %v103_v21  ;;  %v97_v27 = vld [vmem:[%s349_s3] sm:$0xff]  ;;  %v170_v60 = vld [vmem:[%s351_s5 + $0x18] sm:$0xff]  ;;  %v169_v61 = vld [vmem:[%s351_s5 + $0x10] sm:$0xff] }
   0x6   :  { %55 = vmatpush.msra.mxu0 %v27_v2  ;;  %v211_v37 = vld [vmem:[%s347_s2 + $0x1] ss:$0 sm:$0xff]  ;;  %v212_v40 = vld [vmem:[%s347_s2 + $0x2] ss:$0 sm:$0xff]  ;;  %v213_v44 = vld [vmem:[%s348_s4] ss:$0 sm:$0xff]  ;;  %190 = vmatpush.msra.mxu2 %v170_v60 }
   0x7   :  { %205 = vmatmul.msk.f32.vlgmr.msra.gmra.mxu0 %vm32_vm1, %v26_v3  ;;  %v218_v9 = vpop.eup %217  ;;  %120 = vmatpush.msra.mxu1 %v102_v22  ;;  %v168_v62 = vld [vmem:[%s351_s5 + $0x8] sm:$0xff]  ;;  %v167_v63 = vld [vmem:[%s351_s5] sm:$0xff] }
   0x8   :  { %v67_v10 = vmul.f32 64.0, %v218_v9  ;;  %vm71_vm3 = vweird.f32 %v218_v9  ;;  %191 = vmatpush.msra.mxu2 %v169_v61 }
   0x9   :  { %121 = vmatpush.msra.mxu1 %v101_v23 }
   0xa   :  { %v68_v11 = vsub.f32 1.0, %v67_v10  ;;  %192 = vmatpush.msra.mxu2 %v168_v62 }
   0xb   :  { %122 = vmatpush.msra.mxu1 %v100_v24 }
   0xc   :  { %v69_v12 = vmul.f32 %v218_v9, %v68_v11  ;;  %193 = vmatpush.msra.mxu2 %v167_v63 }
   0xd   :  { %123 = vmatpush.msra.mxu1 %v99_v25 }
   0xe   :  { %v70_v13 = vadd.f32 %v218_v9, %v69_v12  ;;  %v215_v12 = vld [vmem:[%s348_s4 + $0x2] ss:$0 sm:$0xff] }
   0xf   :  { %124 = vmatpush.msra.mxu1 %v98_v26 }
  0x10   :  { %v72_v14 = vsel %vm71_vm3, %v218_v9, %v70_v13  ;;  %v214_v9 = vld [vmem:[%s348_s4 + $0x1] ss:$0 sm:$0xff] }
  0x11   :  { %125 = vmatpush.msra.mxu1 %v97_v27 }
  0x84   :  { %v57_v5 = vpop.f32.mrf.mxu0 }
  0x85   :  { %v58_v6 = vadd.f32 %v210_v4, %v57_v5 }
  0x87   :  { %v63_v7 = vsel %vm62_vm2, %v58_v6, 0.0 }
  0x88   :  { %64 = vadd.xlane.f32.xlu0 %v63_v7 }
  0xfb   :  { %v65_v15 = vpop.xlane.xlu0 %64 }
  0xfc   :  { %v73_v16 = vmul.f32 %v72_v14, %v65_v15 }
  0xfe   :  { %v74_v17 = vsub.f32 %v58_v6, %v73_v16  ;;  %v216_v16 = vld [vmem:[%s350_s6] ss:$0 sm:$0xff] }
 0x100   :  { %v75_v18 = vmul.f32 %v74_v17, %v74_v17 }
 0x102   :  { %v76_v19 = vsel %vm62_vm2, %v75_v18, 0.0 }
 0x103   :  { %77 = vadd.xlane.f32.xlu0 %v76_v19 }
 0x176   :  { %v78_v28 = vpop.xlane.xlu0 %77 }
 0x177   :  { %v79_v29 = vmul.f32 %v78_v28, %v72_v14 }
 0x179   :  { %v80_v30 = vadd.f32 1e-05, %v79_v29 }
 0x17b   :  { %219 = vrsqrt.f32 %v80_v30  ;;  %vm87_vm5 = vweird.f32 %v80_v30 }
 0x17c   :  { %221 = vrcp.f32 %v226_v48 }
 0x181   :  { %v220_v31 = vpop.eup %219 }
 0x182   :  { %v82_v32 = vmul.f32 %v220_v31, %v80_v30  ;;  %vm88_vm4 = vweird.f32 %v220_v31  ;;  %v222_v49 = vpop.eup %221 }
 0x183   :  { %vm89_vm6 = vmor %vm87_vm5, %vm88_vm4  ;;  %v137_v50 = vmul.f32 32.0, %v222_v49  ;;  %vm141_vm8 = vweird.f32 %v222_v49 }
 0x184   :  { %v83_v33 = vmul.f32 %v220_v31, %v82_v32 }
 0x185   :  { %v138_v51 = vsub.f32 1.0, %v137_v50 }
 0x186   :  { %v84_v34 = vmul.f32 0.5, %v83_v33 }
 0x187   :  { %v139_v52 = vmul.f32 %v222_v49, %v138_v51 }
 0x188   :  { %v85_v35 = vsub.f32 1.5, %v84_v34 }
 0x189   :  { %v140_v53 = vadd.f32 %v222_v49, %v139_v52 }
 0x18a   :  { %v86_v36 = vmul.f32 %v220_v31, %v85_v35 }
 0x18b   :  { %v142_v54 = vsel %vm141_vm8, %v222_v49, %v140_v53 }
 0x18c   :  { %v90_v38 = vsel %vm89_vm6, %v220_v31, %v86_v36 }
 0x18d   :  { %v91_v39 = vmul.f32 %v90_v38, %v74_v17 }
 0x18f   :  { %v93_v41 = vmul.f32 %v211_v37, %v91_v39 }
 0x191   :  { %v95_v42 = vadd.f32 %v212_v40, %v93_v41 }
 0x193   :  { %v96_v43 = vmax.f32 %v95_v42, 0.0 }
 0x195   :  { %206 = vmatmul.msk.f32.vlgmr.msra.gmra.mxu1 %vm62_vm2, %v96_v43 }
 0x212   :  { %v127_v45 = vpop.f32.mrf.mxu1 }
 0x213   :  { %v128_v46 = vadd.f32 %v213_v44, %v127_v45 }
 0x215   :  { %v133_v47 = vsel %vm132_vm7, %v128_v46, 0.0 }
 0x216   :  { %134 = vadd.xlane.f32.xlu1 %v133_v47 }
 0x289   :  { %v135_v55 = vpop.xlane.xlu1 %134 }
 0x28a   :  { %v143_v56 = vmul.f32 %v142_v54, %v135_v55 }
 0x28c   :  { %v144_v57 = vsub.f32 %v128_v46, %v143_v56 }
 0x28e   :  { %v145_v58 = vmul.f32 %v144_v57, %v144_v57 }
 0x290   :  { %v146_v59 = vsel %vm132_vm7, %v145_v58, 0.0 }
 0x291   :  { %147 = vadd.xlane.f32.xlu1 %v146_v59 }
 0x304   :  { %v148_v0 = vpop.xlane.xlu1 %147 }
 0x305   :  { %v149_v1 = vmul.f32 %v148_v0, %v142_v54 }
 0x307   :  { %v150_v2 = vadd.f32 1e-05, %v149_v1 }
 0x309   :  { %223 = vrsqrt.f32 %v150_v2  ;;  %vm157_vm10 = vweird.f32 %v150_v2 }
 0x30f   :  { %v224_v3 = vpop.eup %223 }
 0x310   :  { %v152_v4 = vmul.f32 %v224_v3, %v150_v2  ;;  %vm158_vm9 = vweird.f32 %v224_v3 }
 0x311   :  { %vm159_vm11 = vmor %vm157_vm10, %vm158_vm9 }
 0x312   :  { %v153_v5 = vmul.f32 %v224_v3, %v152_v4 }
 0x314   :  { %v154_v6 = vmul.f32 0.5, %v153_v5 }
 0x316   :  { %v155_v7 = vsub.f32 1.5, %v154_v6 }
 0x318   :  { %v156_v8 = vmul.f32 %v224_v3, %v155_v7 }
 0x31a   :  { %v160_v10 = vsel %vm159_vm11, %v224_v3, %v156_v8 }
 0x31b   :  { %v161_v11 = vmul.f32 %v160_v10, %v144_v57 }
 0x31d   :  { %v163_v13 = vmul.f32 %v214_v9, %v161_v11 }
 0x31f   :  { %v165_v14 = vadd.f32 %v215_v12, %v163_v13 }
 0x321   :  { %v166_v15 = vmax.f32 %v165_v14, 0.0 }
 0x323   :  { %207 = vmatmul.msk.f32.vlgmr.msra.gmra.mxu2 %vm132_vm7, %v166_v15 }
 0x3a6   :  { %v195_v17 = vpop.f32.mrf.mxu2 }
 0x3a7   :  { %v196_v18 = vadd.f32 %v216_v16, %v195_v17 }
 0x3a9   :  { %199 = vst.msk [vmem:[%s352_s7] sm:$0xff] %vm198_vm12, %v196_v18 }

</bundles_post_ra>
